<compile_context>
chip_gen: v7x
topology: tpu7x:2x2x1
jax: 0.10.0
libtpu: 0.0.40
codegen_flags: <defaults>
</compile_context>

<pallas_src>
import functools

import jax
import jax.numpy as jnp
from jax.experimental import pallas as pl
from jax.experimental.pallas import tpu as pltpu


# ----------------------------- Pallas kernel ------------------------------- #

def _attention_gate_kernel(g_ref, l_ref, wg_ref, wl_ref, b_ref, wpsi_ref,
                           bpsi_ref, out_ref):
    """Fused attention gate on a channel-major (C, TP) voxel tile.

    g_ref:    (Cg, TP)    gating features (channels on sublanes, voxels on lanes)
    l_ref:    (Cl, TP)    skip features
    wg_ref:   (Cint, Cg)  Wg 1x1x1 conv weight (activation dtype)
    wl_ref:   (Cint, Cl)  Wl 1x1x1 conv weight (activation dtype)
    b_ref:    (Cint, 1)   combined bias bg + bl (f32)
    wpsi_ref: (Cint, 1)   psi 1x1x1 conv weight as a column (f32)
    bpsi_ref: (1,)        psi bias (SMEM scalar, f32)
    out_ref:  (Cl, TP)    l * sigmoid(psi(relu(Wg g + Wl l + b)))
    """
    l = l_ref[...]

    # 1x1x1 convs as channel-major matmuls: (Cint, C) @ (C, TP) -> (Cint, TP).
    # Inputs go to the MXU in their native dtype (bf16 or f32), f32 accumulate:
    # no VPU cast pass over the (Cg+Cl, TP) activation tiles.
    h = jnp.dot(wg_ref[...], g_ref[...], preferred_element_type=jnp.float32)
    h = h + jnp.dot(wl_ref[...], l, preferred_element_type=jnp.float32)
    h = jnp.maximum(h + b_ref[...], 0.0)                      # ReLU, (Cint, TP) f32

    # psi projection: K = Cint contraction as VPU broadcast-multiply + sublane
    # reduce (keeps the MXU out of a tiny (Cint, 1) matmul).
    psi = jnp.sum(h * wpsi_ref[...], axis=0, keepdims=True) + bpsi_ref[0]
    attention = jax.nn.sigmoid(psi)                           # (1, TP) f32

    # Gate in the activation dtype; lane-dense store.
    out_ref[...] = (l * attention.astype(l.dtype)).astype(out_ref.dtype)


# ------------------------------- Wrapper ------------------------------------ #

_MIN_GRID_STEPS = 8   # keep the double-buffered pipeline fed on every TC


def _pick_voxel_tile(psp, n, tile_p):
    """Pick a lane-axis tile for the flattened voxel axis P = D*H*W."""
    if psp <= tile_p:
        return psp                       # one full-extent tile, no raggedness
    # Prefer a tile in [tile_p//2, tile_p] (multiples of 512) that divides psp,
    # so the tail block isn't a masked partial store.
    tile = tile_p
    for cand in range(tile_p, max(512, tile_p // 2) - 1, -512):
        if psp % cand == 0:
            tile = cand
            break
    # Keep enough total grid steps for prologue/epilogue DMA overlap
    # (both grid axes are "parallel" and get sharded across TCs on v7x).
    while n * pl.cdiv(psp, tile) < _MIN_GRID_STEPS and tile >= 8192:
        tile //= 2                       # stays a multiple of 128
    return tile


def _nearest_resize_ncdhw(x, size):
    """PyTorch F.interpolate(mode='nearest') over the (D, H, W) axes of NCDHW."""
    out = x
    for ax, out_sz in zip((2, 3, 4), size):
        in_sz = out.shape[ax]
        if in_sz != out_sz:
            idx = jnp.floor(jnp.arange(out_sz) * (in_sz / out_sz)).astype(jnp.int32)
            out = jnp.take(out, idx, axis=ax)
    return out


@functools.partial(jax.jit, static_argnames=("tile_p",))
def attention_gate_pallas(g, l, params, tile_p=65536):
    """g, l: NCDHW arrays (f32 or bf16). params: {'wg','bg','wl','bl','wpsi','bpsi'}.

    tile_p: voxel-tile upper bound (multiple of 512). Sweep ~32768-131072 on
    real volumes; bf16 inputs hit the same bytes/step at 2x larger tile_p.
    """
    wg, bg = params["wg"], params["bg"]          # (Cint, Cg), (Cint,)
    wl, bl = params["wl"], params["bl"]          # (Cint, Cl), (Cint,)
    wpsi, bpsi = params["wpsi"], params["bpsi"]  # (1, Cint), (1,)

    if g.shape[2:] != l.shape[2:]:
        # Nearest interpolation commutes with a 1x1x1 conv, so resizing g
        # *before* Wg equals PyTorch's Wg-then-interpolate.
        # TODO(synk): fuse the nearest-upsample gather into the kernel's g
        # index_map (grid over D/H, replicate along W on lanes) to avoid the
        # extra HBM round-trip of the upsampled g.
        g = _nearest_resize_ncdhw(g, l.shape[2:])

    n, cg = g.shape[0], g.shape[1]
    cl = l.shape[1]
    cint = wg.shape[0]
    d, h, w = l.shape[2:]
    psp = d * h * w

    if tile_p % 512 != 0:
        raise ValueError("tile_p must be a multiple of 512")
    tile = _pick_voxel_tile(psp, n, tile_p)
    num_tiles = pl.cdiv(psp, tile)   # ragged last block handled by Pallas masking

    # Channel-major, spatially-flattened views (free reshapes of NCDHW: no
    # transpose, no pad, no post-slice).
    g_r = g.reshape(n, cg, psp)
    l_r = l.reshape(n, cl, psp)

    # Tiny resident parameters: conv weights in the activation dtype (MXU-native),
    # biases / psi weight in f32 (they feed the f32 intermediate).
    wg_c = wg.astype(g.dtype)                                  # (Cint, Cg)
    wl_c = wl.astype(l.dtype)                                  # (Cint, Cl)
    b_f = (bg + bl).reshape(cint, 1).astype(jnp.float32)       # (Cint, 1)
    wpsi_c = wpsi.reshape(cint, 1).astype(jnp.float32)         # (Cint, 1) column
    bpsi_s = bpsi.reshape(1).astype(jnp.float32)               # (1,) SMEM scalar

    out = pl.pallas_call(
        _attention_gate_kernel,
        out_shape=jax.ShapeDtypeStruct((n, cl, psp), l.dtype),
        grid=(n, num_tiles),
        in_specs=[
            pl.BlockSpec((None, cg, tile), lambda b, i: (b, 0, i)),   # g tile
            pl.BlockSpec((None, cl, tile), lambda b, i: (b, 0, i)),   # l tile
            pl.BlockSpec((cint, cg), lambda b, i: (0, 0)),            # Wg (resident)
            pl.BlockSpec((cint, cl), lambda b, i: (0, 0)),            # Wl (resident)
            pl.BlockSpec((cint, 1), lambda b, i: (0, 0)),             # bg + bl
            pl.BlockSpec((cint, 1), lambda b, i: (0, 0)),             # Wpsi column
            pl.BlockSpec(memory_space=pltpu.MemorySpace.SMEM),        # bpsi scalar
        ],
        out_specs=pl.BlockSpec((None, cl, tile), lambda b, i: (b, 0, i)),
        compiler_params=pltpu.CompilerParams(
            dimension_semantics=("parallel", "parallel"),
            # Above v5e's 16 MiB scoped default (large tiles), below v7x's
            # 64 MiB physical VMEM (double-buffering headroom preserved).
            vmem_limit_bytes=48 * 1024 * 1024,
        ),
    )(g_r, l_r, wg_c, wl_c, b_f, wpsi_c, bpsi_s)

    return out.reshape(n, cl, d, h, w)   # free reshape back to NCDHW


# ---------------------------- Pure-JAX reference ----------------------------- #

def attention_gate_ref(g, l, params):
    wg, bg = params["wg"], params["bl"] * 0 + params["bg"]
    wl, bl = params["wl"], params["bl"]
    wpsi, bpsi = params["wpsi"], params["bpsi"]

    if g.shape[2:] != l.shape[2:]:
        g = _nearest_resize_ncdhw(g, l.shape[2:])

    g1 = jnp.einsum("ncdhw,oc->nodhw", g, wg) + bg[None, :, None, None, None]
    l1 = jnp.einsum("ncdhw,oc->nodhw", l, wl) + bl[None, :, None, None, None]
    psi = jnp.maximum(g1 + l1, 0.0)
    psi = jnp.einsum("ncdhw,oc->nodhw", psi, wpsi) + bpsi[None, :, None, None, None]
    attention = jax.nn.sigmoid(psi)
    return l * attention


# ---------------------------------- Main ------------------------------------ #

if __name__ == "__main__":
    key = jax.random.PRNGKey(0)
    k_g, k_l, k_wg, k_bg, k_wl, k_bl, k_wp, k_bp, k_g2 = jax.random.split(key, 9)

    # Small shapes consistent with the module (NCDHW for Conv3d).
    g_channel, l_channel, int_channel = 4, 6, 8
    n, d, h, w = 2, 4, 16, 16          # P = D*H*W = 1024 voxels per batch item

    g = jax.random.normal(k_g, (n, g_channel, d, h, w), dtype=jnp.float32)
    l = jax.random.normal(k_l, (n, l_channel, d, h, w), dtype=jnp.float32)

    # Deterministic synthetic parameters (no checkpoint load).
    params = {
        "wg": 0.3 * jax.random.normal(k_wg, (int_channel, g_channel), jnp.float32),
        "bg": 0.1 * jax.random.normal(k_bg, (int_channel,), jnp.float32),
        "wl": 0.3 * jax.random.normal(k_wl, (int_channel, l_channel), jnp.float32),
        "bl": 0.1 * jax.random.normal(k_bl, (int_channel,), jnp.float32),
        "wpsi": 0.3 * jax.random.normal(k_wp, (1, int_channel), jnp.float32),
        "bpsi": 0.1 * jax.random.normal(k_bp, (1,), jnp.float32),
    }

    # 1) f32 path, same spatial resolution (tile covers the whole volume here;
    #    the large tile_p default only matters for production-sized volumes).
    out = attention_gate_pallas(g, l, params)
    out = jax.block_until_ready(out)
    ref = attention_gate_ref(g, l, params)
    assert out.shape == ref.shape == (n, l_channel, d, h, w)
    assert jnp.allclose(out, ref, atol=1e-5, rtol=1e-5), "f32 mismatch vs reference"

    # 2) bf16 I/O path (halves HBM bytes on the bandwidth-bound production path).
    g_bf, l_bf = g.astype(jnp.bfloat16), l.astype(jnp.bfloat16)
    out_bf = jax.block_until_ready(attention_gate_pallas(g_bf, l_bf, params))
    ref_bf = attention_gate_ref(g_bf.astype(jnp.float32), l_bf.astype(jnp.float32),
                                params)
    assert out_bf.dtype == jnp.bfloat16
    assert jnp.allclose(out_bf.astype(jnp.float32), ref_bf, atol=3e-2, rtol=3e-2), \
        "bf16 mismatch vs reference"

    # 3) Mismatched resolutions exercise the nearest-upsample path of forward().
    g_lo = jax.random.normal(k_g2, (n, g_channel, d // 2, h // 2, w // 2),
                             dtype=jnp.float32)
    out_up = jax.block_until_ready(attention_gate_pallas(g_lo, l, params))
    ref_up = attention_gate_ref(g_lo, l, params)
    assert jnp.allclose(out_up, ref_up, atol=1e-5, rtol=1e-5), \
        "upsample-path mismatch vs reference"

    print("KERNEL_OK")
</pallas_src>

<mosaic_0001>
module attributes {stable_mosaic.version = 11 : i64} {
  func.func @_attention_gate_kernel(%arg0: i32, %arg1: i32, %arg2: memref<1x4x1024xf32, #tpu.memory_space<vmem>>, %arg3: memref<1x6x1024xf32, #tpu.memory_space<vmem>>, %arg4: memref<8x4xf32, #tpu.memory_space<vmem>>, %arg5: memref<8x6xf32, #tpu.memory_space<vmem>>, %arg6: memref<8x1xf32, #tpu.memory_space<vmem>>, %arg7: memref<8x1xf32, #tpu.memory_space<vmem>>, %arg8: memref<1xf32, #tpu.memory_space<smem>>, %arg9: memref<1x6x1024xf32, #tpu.memory_space<vmem>>) attributes {dimension_semantics = [#tpu.dimension_semantics<parallel>, #tpu.dimension_semantics<parallel>], iteration_bounds = array<i64: 2, 1>, scalar_prefetch = 0 : i64, scratch_operands = 0 : i64, tpu.core_type = #tpu.core_type<tc>, window_params = [{transform_indices = @transform_0, window_bounds = array<i64: 1, 4, 1024>}, {transform_indices = @transform_1, window_bounds = array<i64: 1, 6, 1024>}, {pipeline_mode = #tpu.pipeline_mode<synchronous>, transform_indices = @transform_2, window_bounds = array<i64: 8, 4>}, {pipeline_mode = #tpu.pipeline_mode<synchronous>, transform_indices = @transform_3, window_bounds = array<i64: 8, 6>}, {pipeline_mode = #tpu.pipeline_mode<synchronous>, transform_indices = @transform_4, window_bounds = array<i64: 8, 1>}, {pipeline_mode = #tpu.pipeline_mode<synchronous>, transform_indices = @transform_5, window_bounds = array<i64: 8, 1>}, {transform_indices = @transform_6, window_bounds = array<i64: 1>}, {transform_indices = @transform_7, window_bounds = array<i64: 1, 6, 1024>}]} {
    %c0 = arith.constant 0 : index
    %c0_0 = arith.constant 0 : index
    %c0_1 = arith.constant 0 : index
    %0 = vector.load %arg3[%c0, %c0_0, %c0_1] : memref<1x6x1024xf32, #tpu.memory_space<vmem>>, vector<1x6x1024xf32>
    %1 = vector.shape_cast %0 : vector<1x6x1024xf32> to vector<6x1024xf32>
    %c0_2 = arith.constant 0 : index
    %c0_3 = arith.constant 0 : index
    %2 = vector.load %arg4[%c0_2, %c0_3] : memref<8x4xf32, #tpu.memory_space<vmem>>, vector<8x4xf32>
    %c0_4 = arith.constant 0 : index
    %c0_5 = arith.constant 0 : index
    %c0_6 = arith.constant 0 : index
    %3 = vector.load %arg2[%c0_4, %c0_5, %c0_6] : memref<1x4x1024xf32, #tpu.memory_space<vmem>>, vector<1x4x1024xf32>
    %4 = vector.shape_cast %3 : vector<1x4x1024xf32> to vector<4x1024xf32>
    %cst = arith.constant dense<0.000000e+00> : vector<8x1024xf32>
    %5 = tpu.matmul %2, %4, %cst {dimension_numbers = #tpu.dot_dimension_numbers<[1], [0], [0], [1], [0, 0, 1, 1], [], []>} : vector<8x4xf32>, vector<4x1024xf32>, vector<8x1024xf32> -> vector<8x1024xf32>
    %c0_7 = arith.constant 0 : index
    %c0_8 = arith.constant 0 : index
    %6 = vector.load %arg5[%c0_7, %c0_8] : memref<8x6xf32, #tpu.memory_space<vmem>>, vector<8x6xf32>
    %cst_9 = arith.constant dense<0.000000e+00> : vector<8x1024xf32>
    %7 = tpu.matmul %6, %1, %cst_9 {dimension_numbers = #tpu.dot_dimension_numbers<[1], [0], [0], [1], [0, 0, 1, 1], [], []>} : vector<8x6xf32>, vector<6x1024xf32>, vector<8x1024xf32> -> vector<8x1024xf32>
    %8 = arith.addf %5, %7 : vector<8x1024xf32>
    %c0_10 = arith.constant 0 : index
    %c0_11 = arith.constant 0 : index
    %9 = vector.load %arg6[%c0_10, %c0_11] : memref<8x1xf32, #tpu.memory_space<vmem>>, vector<8x1xf32>
    %10 = vector.broadcast %9 : vector<8x1xf32> to vector<8x1024xf32>
    %11 = arith.addf %8, %10 : vector<8x1024xf32>
    %cst_12 = arith.constant 0.000000e+00 : f32
    %12 = vector.broadcast %cst_12 : f32 to vector<8x1024xf32>
    %13 = arith.maximumf %11, %12 : vector<8x1024xf32>
    %c0_13 = arith.constant 0 : index
    %c0_14 = arith.constant 0 : index
    %14 = vector.load %arg7[%c0_13, %c0_14] : memref<8x1xf32, #tpu.memory_space<vmem>>, vector<8x1xf32>
    %15 = vector.broadcast %14 : vector<8x1xf32> to vector<8x1024xf32>
    %16 = arith.mulf %13, %15 : vector<8x1024xf32>
    %cst_15 = arith.constant dense<0.000000e+00> : vector<1024xf32>
    %17 = vector.multi_reduction <add>, %16, %cst_15 [0] : vector<8x1024xf32> to vector<1024xf32>
    %18 = vector.shape_cast %17 : vector<1024xf32> to vector<1x1024xf32>
    %c0_16 = arith.constant 0 : index
    %19 = memref.load %arg8[%c0_16] : memref<1xf32, #tpu.memory_space<smem>>
    %20 = vector.broadcast %19 : f32 to vector<1x1024xf32>
    %21 = arith.addf %18, %20 : vector<1x1024xf32>
    %22 = arith.negf %21 : vector<1x1024xf32>
    %23 = math.exp %22 : vector<1x1024xf32>
    %cst_17 = arith.constant 1.000000e+00 : f32
    %24 = vector.broadcast %cst_17 : f32 to vector<1x1024xf32>
    %25 = arith.addf %24, %23 : vector<1x1024xf32>
    %26 = arith.divf %24, %25 : vector<1x1024xf32>
    %27 = vector.broadcast %26 : vector<1x1024xf32> to vector<6x1024xf32>
    %28 = arith.mulf %1, %27 : vector<6x1024xf32>
    %c0_18 = arith.constant 0 : index
    %c0_19 = arith.constant 0 : index
    %c0_20 = arith.constant 0 : index
    %29 = vector.load %arg9[%c0_18, %c0_19, %c0_20] : memref<1x6x1024xf32, #tpu.memory_space<vmem>>, vector<1x6x1024xf32>
    %30 = vector.shape_cast %29 : vector<1x6x1024xf32> to vector<6x1024xf32>
    %31 = vector.shape_cast %28 : vector<6x1024xf32> to vector<1x6x1024xf32>
    tpu.vector_store %arg9[%c0_18, %c0_19, %c0_20], %31 {strides = array<i32>} : memref<1x6x1024xf32, #tpu.memory_space<vmem>>, vector<1x6x1024xf32>,
    return
  }
  func.func @transform_0(%arg0: i32, %arg1: i32) -> (i32, i32, i32) {
    %c0_i32 = arith.constant 0 : i32
    %c0_i32_0 = arith.constant 0 : i32
    return %arg0, %c0_i32, %arg1 : i32, i32, i32
  }
  func.func @transform_1(%arg0: i32, %arg1: i32) -> (i32, i32, i32) {
    %c0_i32 = arith.constant 0 : i32
    %c0_i32_0 = arith.constant 0 : i32
    return %arg0, %c0_i32, %arg1 : i32, i32, i32
  }
  func.func @transform_2(%arg0: i32, %arg1: i32) -> (i32, i32) {
    %c0_i32 = arith.constant 0 : i32
    %c0_i32_0 = arith.constant 0 : i32
    %c0_i32_1 = arith.constant 0 : i32
    return %c0_i32, %c0_i32_0 : i32, i32
  }
  func.func @transform_3(%arg0: i32, %arg1: i32) -> (i32, i32) {
    %c0_i32 = arith.constant 0 : i32
    %c0_i32_0 = arith.constant 0 : i32
    %c0_i32_1 = arith.constant 0 : i32
    return %c0_i32, %c0_i32_0 : i32, i32
  }
  func.func @transform_4(%arg0: i32, %arg1: i32) -> (i32, i32) {
    %c0_i32 = arith.constant 0 : i32
    %c0_i32_0 = arith.constant 0 : i32
    %c0_i32_1 = arith.constant 0 : i32
    return %c0_i32, %c0_i32_0 : i32, i32
  }
  func.func @transform_5(%arg0: i32, %arg1: i32) -> (i32, i32) {
    %c0_i32 = arith.constant 0 : i32
    %c0_i32_0 = arith.constant 0 : i32
    %c0_i32_1 = arith.constant 0 : i32
    return %c0_i32, %c0_i32_0 : i32, i32
  }
  func.func @transform_6(%arg0: i32, %arg1: i32) -> i32 {
    %c0_i32 = arith.constant 0 : i32
    %c0_i32_0 = arith.constant 0 : i32
    return %c0_i32 : i32
  }
  func.func @transform_7(%arg0: i32, %arg1: i32) -> (i32, i32, i32) {
    %c0_i32 = arith.constant 0 : i32
    %c0_i32_0 = arith.constant 0 : i32
    return %arg0, %c0_i32, %arg1 : i32, i32, i32
  }
}

</mosaic_0001>

<bundles_post_ra>
// kernel: attention_gate_pallas.1
= control target key start
LH: loop header
LB: loop body
LE: loop exit
PB: predicated region body
PF: predicated region fallthrough
CT: control target
= control target key end

     0   :  { %s1446_s26 = smov 0   ;;  %s1448_s27 = smov 0   ;;  %s1568_s0 = inlined_call_operand.vmem [shape: f32[2,4,1024], index: 0, kind: input, shape index: {}]   ;;  %s1569_s1 = inlined_call_operand.vmem [shape: f32[2,6,1024], index: 1, kind: input, shape index: {}]   ;;  %s1570_s2 = inlined_call_operand.vmem [shape: f32[8,4], index: 2, kind: input, shape index: {}]   ;;  %s1571_s3 = inlined_call_operand.vmem [shape: f32[8,6], index: 3, kind: input, shape index: {}]   ;;  %s1572_s4 = inlined_call_operand.vmem [shape: f32[8,1], index: 4, kind: input, shape index: {}]   ;;  %s1573_s5 = inlined_call_operand.vmem [shape: f32[8,1], index: 5, kind: input, shape index: {}]   ;;  %s1574_s6 = inlined_call_operand.<no memory space> [shape: f32[1], index: 6, kind: input, shape index: {}]   ;;  %s1575_s7 = inlined_call_operand.vmem [shape: f32[2,6,1024], index: 7, kind: output, shape index: {}]  }
   0x1   :  { %12 = sst [smem:[#allocation2]] %s1574_s6  ;;  %s1450_s28 = smov 0  }
   0x2 LB: > { %s30_s6 = sadd.s32 1, %s1395_s27  ;;  %p1262_p0 = scmp.ge.s32.totalorder %s1399_s28, 1  ;;  %s1399_s28 = sphi %s1450_s28, %s18_s28   ;;  %s1395_s27 = sphi %s1448_s27, %s1577_s27   ;;  %s1391_s26 = sphi %s1446_s26, %s1576_s26  }
   0x3   : > { %p32_p1 = scmp.ge.s32.totalorder %s30_s6, 2  ;;  %p276_p2 = scmp.lt.s32.totalorder %s1399_s28, 3 }
   0x5   : > { %s1579_s6 = smov (%p32_p1, %s30_s6), 0  ;;  %p277_p3 = pnand %p1262_p0, %p276_p2 }
   0x6   : > { %p326_p4 = scmp.lt.s32.totalorder (!%p277_p3), %s1391_s26, 1  ;;  %v1401_v0 = vmov (!%p277_p3), 0.0   ;;  %v995_v1 = vld [vmem:[%s1572_s4] sm:$0xff] (!%p277_p3)  ;;  %v1402_v2 = vmov (!%p277_p3), 0   ;;  %vm373_vm0 = vcmask (!%p277_p3), 1045504   ;;  %vm369_vm1 = vcmask (!%p277_p3), 48128  }
   0x7   : > { %280 = sbr.rel (%p277_p3) target bundleno = 296 (0x128), region = 48  ;;  %462 = vmatprep.mubr.f32.mxu0 (!%p277_p3), %v1401_v0  ;;  %533 = vmatprep.mubr.f32.mxu1 (!%p277_p3), %v1401_v0  ;;  %v368_v3 = vld [vmem:[%s1571_s3] sm:$0xff] (!%p277_p3)  ;;  %vm694_vm2 = vcmask (!%p277_p3), 1043456   ;;  %vm690_vm3 = vcmask (!%p277_p3), 31744   ;;  %s1079_s22 = sld [smem:[#allocation2]] (!%p277_p3) }
   0x8   : > { %1340 = vset.pattern.permute.xlu0 (!%p277_p3), %v1402_v2  ;;  %v363_v18 = vld [vmem:[%s1570_s2] sm:$0xff] (!%p277_p3) }
   0x9   : > { %998 = vperm.xlu0 (!%p277_p3), %1340, %v995_v1   ;;  %v1017_v21 = vld [vmem:[%s1573_s5] sm:$0xff] (!%p277_p3) }
   0xd   : > { %1020 = vperm.xlu0 (!%p277_p3), %1340, %v1017_v21   ;;  %v1536_v36 = vstv (!%p277_p3), %s1079_s22 }
   0xe   : > { %s1581_s26 = smov (!%p326_p4, %s1391_s26), 1 }
   0xf   : > { %s1304_s8 = sshll.u32 %s1581_s26, 6  ;;  %s1303_s9 = sshll.u32 %s1581_s26, 5 }
  0x10   : > { %s343_s12 = scalar_lea.vmem %s1569_s1, %s1304_s8  ;;  %s333_s17 = scalar_lea.vmem %s1568_s0, %s1303_s9 }
  0x11   : > { %v1479_v4 = vld [vmem:[%s343_s12 + $0x8] sm:$0x3f]  ;;  %v1481_v5 = vld [vmem:[%s343_s12 + $0x18] sm:$0x3f]  ;;  %v1483_v6 = vld [vmem:[%s343_s12] sm:$0x3f]  ;;  %s353_s25 = scalar_lea.vmem %s1575_s7, %s1304_s8 }
  0x12   : > { %1269 = vmatprep.subr.msk.mxu0 %vm373_vm0, %v1479_v4  ;;  %1272 = vmatprep.subr.msk.mxu1 %vm373_vm0, %v1481_v5  ;;  %v1492_v7 = vld [vmem:[%s343_s12 + $0x10] sm:$0x3f]  ;;  %v1494_v8 = vld [vmem:[%s343_s12 + $0x28] sm:$0x3f]  ;;  %v1496_v9 = vld [vmem:[%s343_s12 + $0x38] sm:$0x3f] }
  0x13   : > { %1270 = vmatpush1.msk.msra.mxu0 %vm373_vm0, %v1483_v6  ;;  %1273 = vmatpush1.msk.msra.mxu1 %vm373_vm0, %v1492_v7  ;;  %v1502_v10 = vld [vmem:[%s343_s12 + $0x20] sm:$0x3f]  ;;  %v1504_v11 = vld [vmem:[%s343_s12 + $0x30] sm:$0x3f]  ;;  %v365_v13 = vld [vmem:[%s333_s17 + $0x8] sm:$0xff] }
  0x14   : > { %v364_v12 = vld [vmem:[%s333_s17] sm:$0xff]  ;;  %1271 = vmatmul.mubr.msk.f32.vlgmr.msra.gmra.mrb[0].mxu0 %vm369_vm1, %v368_v3  ;;  %1274 = vmatmul.mubr.msk.f32.vlgmr.msra.gmra.mrb[0].mxu1 %vm369_vm1, %v368_v3  ;;  %v687_v15 = vcombine.high %v365_v13, %v365_v13  ;;  %v366_v16 = vld [vmem:[%s333_s17 + $0x10] sm:$0xff]  ;;  %v367_v17 = vld [vmem:[%s333_s17 + $0x18] sm:$0xff] }
  0x15   : > { %1275 = vmatprep.subr.msk.mxu0 %vm373_vm0, %v1494_v8  ;;  %1278 = vmatprep.subr.msk.mxu1 %vm373_vm0, %v1496_v9  ;;  %v686_v14 = vcombine.high %v364_v12, %v364_v12  ;;  %v688_v19 = vcombine.high %v366_v16, %v366_v16  ;;  %v689_v20 = vcombine.high %v367_v17, %v367_v17 }
  0x16   : > { %1276 = vmatpush1.msk.msra.mxu0 %vm373_vm0, %v1502_v10  ;;  %1279 = vmatpush1.msk.msra.mxu1 %vm373_vm0, %v1504_v11 }
  0x17   : > { %604 = vmatprep.mubr.f32.mxu0 %v1401_v0  ;;  %675 = vmatprep.mubr.f32.mxu1 %v1401_v0 }
  0x18   : > { %1277 = vmatmul.mubr.msk.f32.vlgmr.msra.gmra.mrb[2].mxu0 %vm369_vm1, %v368_v3  ;;  %1280 = vmatmul.mubr.msk.f32.vlgmr.msra.gmra.mrb[2].mxu1 %vm369_vm1, %v368_v3 }
  0x19   : > { %1281 = vmatprep.subr.msk.mxu0 %vm694_vm2, %v686_v14  ;;  %1284 = vmatprep.subr.msk.mxu1 %vm694_vm2, %v687_v15 }
  0x1a   : > { %1282 = vmatpush1.msk.msra.mxu0 %vm694_vm2, %v364_v12  ;;  %1285 = vmatpush1.msk.msra.mxu1 %vm694_vm2, %v365_v13 }
  0x1b   : > { %775 = vmatprep.mubr.f32.mxu0 %v1401_v0  ;;  %846 = vmatprep.mubr.f32.mxu1 %v1401_v0 }
  0x1c   : > { %1283 = vmatmul.mubr.msk.f32.vlgmr.msra.gmra.mrb[0].mxu0 %vm690_vm3, %v363_v18  ;;  %1286 = vmatmul.mubr.msk.f32.vlgmr.msra.gmra.mrb[0].mxu1 %vm690_vm3, %v363_v18 }
  0x1d   : > { %1287 = vmatprep.subr.msk.mxu0 %vm694_vm2, %v688_v19  ;;  %1290 = vmatprep.subr.msk.mxu1 %vm694_vm2, %v689_v20 }
  0x1e   : > { %1288 = vmatpush1.msk.msra.mxu0 %vm694_vm2, %v366_v16  ;;  %1291 = vmatpush1.msk.msra.mxu1 %vm694_vm2, %v367_v17 }
  0x1f   : > { %917 = vmatprep.mubr.f32.mxu0 %v1401_v0  ;;  %988 = vmatprep.mubr.f32.mxu1 %v1401_v0 }
  0x20   : > { %1289 = vmatmul.mubr.msk.f32.vlgmr.msra.gmra.mrb[2].mxu0 %vm690_vm3, %v363_v18  ;;  %1292 = vmatmul.mubr.msk.f32.vlgmr.msra.gmra.mrb[2].mxu1 %vm690_vm3, %v363_v18 }
  0x88   : > { %v999_v22 = vpop.permute.xlu0 %998 }
  0x8c   : > { %v1021_v31 = vpop.permute.xlu0 %1020 }
  0xef   : > { %v777_v23 = vpop.f32.mrb[0].mxu0  ;;  %v848_v24 = vpop.f32.mrb[0].mxu1 }
  0xf0   : > { %v1001_v25 = vadd.f32 %v999_v22, %v777_v23  ;;  %v1003_v26 = vadd.f32 %v999_v22, %v848_v24  ;;  %v779_v27 = vpop.f32.mrb[1].mxu0  ;;  %v850_v28 = vpop.f32.mrb[1].mxu1 }
  0xf1   : > { %v1002_v29 = vadd.f32 %v999_v22, %v779_v27  ;;  %v1004_v30 = vadd.f32 %v999_v22, %v850_v28 }
  0xf2   : > { %v1009_v32 = vmax.f32 %v1001_v25, 0.0  ;;  %v1011_v33 = vmax.f32 %v1003_v26, 0.0 }
  0xf3   : > { %v1010_v34 = vmax.f32 %v1002_v29, 0.0  ;;  %v1012_v35 = vmax.f32 %v1004_v30, 0.0  ;;  %v919_v37 = vpop.f32.mrb[2].mxu0  ;;  %v990_v38 = vpop.f32.mrb[2].mxu1 }
  0xf4   : > { %v1023_v39 = vmul.f32 %v1021_v31, %v1009_v32  ;;  %v1025_v40 = vmul.f32 %v1021_v31, %v1011_v33  ;;  %v1005_v41 = vadd.f32 %v999_v22, %v919_v37  ;;  %v1007_v42 = vadd.f32 %v999_v22, %v990_v38  ;;  %v921_v43 = vpop.f32.mrb[3].mxu0  ;;  %v992_v44 = vpop.f32.mrb[3].mxu1 }
  0xf5   : > { %v1024_v45 = vmul.f32 %v1021_v31, %v1010_v34  ;;  %v1026_v46 = vmul.f32 %v1021_v31, %v1012_v35  ;;  %v1006_v47 = vadd.f32 %v999_v22, %v921_v43  ;;  %v1008_v48 = vadd.f32 %v999_v22, %v992_v44 }
  0xf6   : > { %v1031_v49 = vrot.slane %v1023_v39, 4  ;;  %v1043_v50 = vrot.slane %v1025_v40, 4  ;;  %v1013_v51 = vmax.f32 %v1005_v41, 0.0  ;;  %v1015_v52 = vmax.f32 %v1007_v42, 0.0 }
  0xf7   : > { %v1037_v53 = vrot.slane %v1024_v45, 4  ;;  %v1049_v54 = vrot.slane %v1026_v46, 4  ;;  %v1014_v55 = vmax.f32 %v1006_v47, 0.0  ;;  %v1016_v56 = vmax.f32 %v1008_v48, 0.0 }
  0xf8   : > { %v1032_v57 = vadd.f32 %v1031_v49, %v1023_v39  ;;  %v1044_v58 = vadd.f32 %v1043_v50, %v1025_v40  ;;  %v1027_v59 = vmul.f32 %v1021_v31, %v1013_v51  ;;  %v1029_v60 = vmul.f32 %v1021_v31, %v1015_v52 }
  0xf9   : > { %v1038_v61 = vadd.f32 %v1037_v53, %v1024_v45  ;;  %v1050_v62 = vadd.f32 %v1049_v54, %v1026_v46  ;;  %v1028_v63 = vmul.f32 %v1021_v31, %v1014_v55  ;;  %v1030_v0 = vmul.f32 %v1021_v31, %v1016_v56 }
  0xfa   : > { %v1033_v1 = vrot.slane %v1032_v57, 2  ;;  %v1045_v2 = vrot.slane %v1044_v58, 2  ;;  %v1055_v3 = vrot.slane %v1027_v59, 4  ;;  %v1067_v12 = vrot.slane %v1029_v60, 4 }
  0xfb   : > { %v1039_v13 = vrot.slane %v1038_v61, 2  ;;  %v1051_v14 = vrot.slane %v1050_v62, 2  ;;  %v1061_v15 = vrot.slane %v1028_v63, 4  ;;  %v1073_v16 = vrot.slane %v1030_v0, 4 }
  0xfc   : > { %v1034_v17 = vadd.f32 %v1033_v1, %v1032_v57  ;;  %v1046_v18 = vadd.f32 %v1045_v2, %v1044_v58  ;;  %v1056_v19 = vadd.f32 %v1055_v3, %v1027_v59  ;;  %v1068_v20 = vadd.f32 %v1067_v12, %v1029_v60 }
  0xfd   : > { %v1040_v21 = vadd.f32 %v1039_v13, %v1038_v61  ;;  %v1052_v22 = vadd.f32 %v1051_v14, %v1050_v62  ;;  %v1062_v23 = vadd.f32 %v1061_v15, %v1028_v63  ;;  %v1074_v24 = vadd.f32 %v1073_v16, %v1030_v0 }
  0xfe   : > { %v1035_v25 = vrot.slane %v1034_v17, 1  ;;  %v1047_v26 = vrot.slane %v1046_v18, 1  ;;  %v1057_v27 = vrot.slane %v1056_v19, 2  ;;  %v1069_v28 = vrot.slane %v1068_v20, 2 }
  0xff   : > { %v1041_v29 = vrot.slane %v1040_v21, 1  ;;  %v1053_v30 = vrot.slane %v1052_v22, 1  ;;  %v1063_v31 = vrot.slane %v1062_v23, 2  ;;  %v1075_v32 = vrot.slane %v1074_v24, 2 }
 0x100   : > { %v1036_v33 = vadd.f32 %v1035_v25, %v1034_v17  ;;  %v1048_v34 = vadd.f32 %v1047_v26, %v1046_v18  ;;  %v1058_v35 = vadd.f32 %v1057_v27, %v1056_v19  ;;  %v1070_v37 = vadd.f32 %v1069_v28, %v1068_v20 }
 0x101   : > { %v1042_v38 = vadd.f32 %v1041_v29, %v1040_v21  ;;  %v1054_v39 = vadd.f32 %v1053_v30, %v1052_v22  ;;  %v1064_v40 = vadd.f32 %v1063_v31, %v1062_v23  ;;  %v1076_v41 = vadd.f32 %v1075_v32, %v1074_v24 }
 0x102   : > { %v1081_v42 = vadd.f32 %v1536_v36, %v1036_v33  ;;  %v1083_v43 = vadd.f32 %v1536_v36, %v1048_v34  ;;  %v1059_v44 = vrot.slane %v1058_v35, 1  ;;  %v1071_v45 = vrot.slane %v1070_v37, 1 }
 0x103   : > { %v1082_v46 = vadd.f32 %v1536_v36, %v1042_v38  ;;  %v1084_v47 = vadd.f32 %v1536_v36, %v1054_v39  ;;  %v1065_v48 = vrot.slane %v1064_v40, 1  ;;  %v1077_v49 = vrot.slane %v1076_v41, 1 }
 0x104   : > { %v1293_v50 = vmul.f32 -1.442695, %v1081_v42  ;;  %v1295_v51 = vmul.f32 -1.442695, %v1083_v43  ;;  %v1060_v52 = vadd.f32 %v1059_v44, %v1058_v35  ;;  %v1072_v53 = vadd.f32 %v1071_v45, %v1070_v37 }
 0x105   : > { %v1294_v54 = vmul.f32 -1.442695, %v1082_v46  ;;  %v1296_v55 = vmul.f32 -1.442695, %v1084_v47  ;;  %v1066_v56 = vadd.f32 %v1065_v48, %v1064_v40  ;;  %v1078_v57 = vadd.f32 %v1077_v49, %v1076_v41 }
 0x106   : > { %1345 = vpow2.f32 %v1293_v50  ;;  %v1085_v58 = vadd.f32 %v1536_v36, %v1060_v52  ;;  %v1087_v59 = vadd.f32 %v1536_v36, %v1072_v53 }
 0x107   : > { %1347 = vpow2.f32 %v1294_v54  ;;  %v1086_v60 = vadd.f32 %v1536_v36, %v1066_v56  ;;  %v1088_v61 = vadd.f32 %v1536_v36, %v1078_v57 }
 0x108   : > { %1349 = vpow2.f32 %v1295_v51  ;;  %v1297_v62 = vmul.f32 -1.442695, %v1085_v58  ;;  %v1299_v63 = vmul.f32 -1.442695, %v1087_v59 }
 0x109   : > { %1351 = vpow2.f32 %v1296_v55  ;;  %v1298_v0 = vmul.f32 -1.442695, %v1086_v60  ;;  %v1300_v1 = vmul.f32 -1.442695, %v1088_v61 }
 0x10a   : > { %1353 = vpow2.f32 %v1297_v62 }
 0x10b   : > { %1355 = vpow2.f32 %v1299_v63 }
 0x10c   : > { %1357 = vpow2.f32 %v1298_v0 }
 0x10d   : > { %1359 = vpow2.f32 %v1300_v1 }
 0x110   : > { %v1346_v2 = vpop.eup %1345 }
 0x111   : > { %v1348_v3 = vpop.eup %1347  ;;  %v1113_v12 = vadd.f32 1.0, %v1346_v2 }
 0x112   : > { %v1350_v13 = vpop.eup %1349  ;;  %v1114_v14 = vadd.f32 1.0, %v1348_v3 }
 0x113   : > { %v1352_v15 = vpop.eup %1351  ;;  %v1115_v16 = vadd.f32 1.0, %v1350_v13  ;;  %1361 = vrcp.f32 %v1113_v12 }
 0x114   : > { %v1354_v17 = vpop.eup %1353  ;;  %v1116_v36 = vadd.f32 1.0, %v1352_v15  ;;  %1363 = vrcp.f32 %v1114_v14 }
 0x115   : > { %v1356_v18 = vpop.eup %1355  ;;  %1365 = vrcp.f32 %v1115_v16  ;;  %v1117_v19 = vadd.f32 1.0, %v1354_v17 }
 0x116   : > { %v1358_v20 = vpop.eup %1357  ;;  %1367 = vrcp.f32 %v1116_v36  ;;  %v1119_v21 = vadd.f32 1.0, %v1356_v18 }
 0x117   : > { %v1360_v22 = vpop.eup %1359  ;;  %1369 = vrcp.f32 %v1117_v19  ;;  %v1118_v23 = vadd.f32 1.0, %v1358_v20 }
 0x118   : > { %1371 = vrcp.f32 %v1119_v21  ;;  %v1120_v24 = vadd.f32 1.0, %v1360_v22 }
 0x119   : > { %1373 = vrcp.f32 %v1118_v23 }
 0x11a   : > { %1375 = vrcp.f32 %v1120_v24 }
 0x11d   : > { %v1362_v25 = vpop.eup %1361 }
 0x11e   : > { %v1364_v26 = vpop.eup %1363  ;;  %v1137_v27 = vmul.f32 %v1362_v25, %v1483_v6 }
 0x11f   : > { %v1366_v28 = vpop.eup %1365  ;;  %v1138_v29 = vmul.f32 %v1364_v26, %v1479_v4 }
 0x120   : > { %v1368_v30 = vpop.eup %1367  ;;  %v1139_v31 = vmul.f32 %v1366_v28, %v1492_v7  ;;  %1145 = vst [vmem:[%s353_s25] sm:$0x3f] %v1137_v27 }
 0x121   : > { %v1370_v32 = vpop.eup %1369  ;;  %v1140_v33 = vmul.f32 %v1368_v30, %v1481_v5  ;;  %1146 = vst [vmem:[%s353_s25 + $0x8] sm:$0x3f] %v1138_v29 }
 0x122   : > { %v1372_v34 = vpop.eup %1371  ;;  %1147 = vst [vmem:[%s353_s25 + $0x10] sm:$0x3f] %v1139_v31  ;;  %v1141_v35 = vmul.f32 %v1370_v32, %v1502_v10 }
 0x123   : > { %v1374_v37 = vpop.eup %1373  ;;  %1148 = vst [vmem:[%s353_s25 + $0x18] sm:$0x3f] %v1140_v33  ;;  %v1143_v38 = vmul.f32 %v1372_v34, %v1504_v11 }
 0x124   : > { %v1376_v6 = vpop.eup %1375  ;;  %1149 = vst [vmem:[%s353_s25 + $0x20] sm:$0x3f] %v1141_v35  ;;  %v1142_v4 = vmul.f32 %v1374_v37, %v1494_v8 }
 0x125   : > { %1151 = vst [vmem:[%s353_s25 + $0x30] sm:$0x3f] %v1143_v38  ;;  %v1144_v7 = vmul.f32 %v1376_v6, %v1496_v9 }
 0x126   : > { %1150 = vst [vmem:[%s353_s25 + $0x28] sm:$0x3f] %v1142_v4 }
 0x127   : > { %1152 = vst [vmem:[%s353_s25 + $0x38] sm:$0x3f] %v1144_v7 }
 0x128 PF: > { %s18_s28 = sadd.s32 1, %s1399_s28   ;;  %s1576_s26 = smov %s1395_s27 }
 0x129   : > { %p15_p5 = scmp.ge.s32.totalorder %s18_s28, 4   ;;  %s1577_s27 = smov %s1579_s6 }
 0x12b   :  { %17 = sbr.rel (!%p15_p5) target bundleno = 2 (0x2), region = 81 }

</bundles_post_ra>
